<compile_context>
chip_gen: v5e
topology: v5e:2x2
jax: 0.10.0
libtpu: 0.0.40
codegen_flags: <defaults>
</compile_context>

<pallas_src>
import functools

import jax
import jax.numpy as jnp
import numpy as np
from jax.experimental import pallas as pl
from jax.experimental.pallas import tpu as pltpu


VMEM_LIMIT = 32 * 1024 * 1024  # safe on v5e/v6e/v7x; per-call footprint is ~2 MB


def _round_up(x, m):
    return (x + m - 1) // m * m


def _choose_tm(m):
    if m >= 512:
        return 256
    if m >= 128:
        return 128
    return _round_up(max(m, 1), 8)


def _choose_rows(m, cap):
    if m >= cap:
        return cap
    return _round_up(max(m, 1), 8)


def _choose_div(total, candidates):
    for c in candidates:
        if total % c == 0:
            return c
    return candidates[-1]


# ----------------------------- Pallas kernels -----------------------------

def _matmul_bn_kernel(*refs, relu, has_residual):
    """acc += a @ b; epilogue: y = acc*scale + shift (+ residual) (+ ReLU)."""
    if has_residual:
        a_ref, b_ref, s_ref, t_ref, r_ref, o_ref, acc_ref = refs
    else:
        a_ref, b_ref, s_ref, t_ref, o_ref, acc_ref = refs
        r_ref = None

    k = pl.program_id(2)

    @pl.when(k == 0)
    def _():
        acc_ref[...] = jnp.zeros_like(acc_ref)

    acc_ref[...] += jnp.dot(a_ref[...], b_ref[...],
                            preferred_element_type=jnp.float32)

    @pl.when(k == pl.num_programs(2) - 1)
    def _():
        y = acc_ref[...] * s_ref[...] + t_ref[...]
        if has_residual:
            y = y + r_ref[...].astype(jnp.float32)
        if relu:
            y = jnp.maximum(y, 0.0)
        o_ref[...] = y.astype(o_ref.dtype)


def _max9_kernel(x_ref, o_ref):
    # x: (9, tm, C) shifted 3x3 windows -> elementwise max over the 9 taps.
    o_ref[...] = jnp.max(x_ref[...], axis=0)


def _avgpool_kernel(x_ref, o_ref):
    # x: (1, H*W, C) -> (1, 1, C) mean (f32 accumulate).
    o_ref[...] = jnp.mean(x_ref[...].astype(jnp.float32), axis=1,
                          keepdims=True).astype(o_ref.dtype)


# ----------------------------- matmul wrappers -----------------------------

@functools.partial(jax.jit, static_argnames=("relu", "out_dtype"))
def matmul_bn_act(a, b, scale, shift, residual=None, *, relu,
                  out_dtype=jnp.bfloat16):
    """act((a @ b) * scale + shift [+ residual]).  a:(M,K) b:(K,N)."""
    M, K = a.shape
    N = b.shape[1]
    tm = _choose_tm(M)
    Mp = _round_up(M, tm)
    Kp = _round_up(K, 128)
    tk = _choose_div(Kp, (512, 256, 128))
    Np = _round_up(N, 128)
    tn = _choose_div(Np, (256, 128))

    a_p = jnp.pad(a.astype(jnp.bfloat16), ((0, Mp - M), (0, Kp - K)))
    b_p = jnp.pad(b.astype(jnp.bfloat16), ((0, Kp - K), (0, Np - N)))
    s_p = jnp.pad(scale.astype(jnp.float32).reshape(1, N), ((0, 0), (0, Np - N)))
    t_p = jnp.pad(shift.astype(jnp.float32).reshape(1, N), ((0, 0), (0, Np - N)))

    in_specs = [
        pl.BlockSpec((tm, tk), lambda i, j, k: (i, k)),
        pl.BlockSpec((tk, tn), lambda i, j, k: (k, j)),
        pl.BlockSpec((1, tn), lambda i, j, k: (0, j)),
        pl.BlockSpec((1, tn), lambda i, j, k: (0, j)),
    ]
    args = [a_p, b_p, s_p, t_p]
    has_residual = residual is not None
    if has_residual:
        r_p = jnp.pad(residual.astype(jnp.bfloat16),
                      ((0, Mp - M), (0, Np - N)))
        in_specs.append(pl.BlockSpec((tm, tn), lambda i, j, k: (i, j)))
        args.append(r_p)

    grid = (Mp // tm, Np // tn, Kp // tk)
    out = pl.pallas_call(
        functools.partial(_matmul_bn_kernel, relu=relu,
                          has_residual=has_residual),
        out_shape=jax.ShapeDtypeStruct((Mp, Np), out_dtype),
        grid_spec=pltpu.PrefetchScalarGridSpec(
            num_scalar_prefetch=0,
            grid=grid,
            in_specs=in_specs,
            out_specs=pl.BlockSpec((tm, tn), lambda i, j, k: (i, j)),
            scratch_shapes=[pltpu.VMEM((tm, tn), jnp.float32)],
        ),
        compiler_params=pltpu.CompilerParams(
            dimension_semantics=("parallel", "parallel", "arbitrary"),
            vmem_limit_bytes=VMEM_LIMIT),
    )(*args)
    return out[:M, :N]


@jax.jit
def grouped_matmul_bn_relu(a, b3, scale, shift):
    """Grouped (super-group packed) conv matmul + BN + ReLU.

    a:  (M, n_super * KP)   im2col patches, channel-major K layout.
    b3: (n_super, KP, 128)  packed block-diagonal weights (bf16).
    Output: (M, n_super * 128) bf16.
    """
    M, ktot = a.shape
    n_super, KP, TN = b3.shape
    assert ktot == n_super * KP
    width = n_super * TN

    tm = _choose_tm(M)
    Mp = _round_up(M, tm)
    a_p = jnp.pad(a.astype(jnp.bfloat16), ((0, Mp - M), (0, 0)))
    b2 = b3.reshape(n_super * KP, TN).astype(jnp.bfloat16)
    s_p = scale.astype(jnp.float32).reshape(1, width)
    t_p = shift.astype(jnp.float32).reshape(1, width)

    grid = (Mp // tm, n_super, 1)  # one K step: KP = 9*128 fits a single tile
    out = pl.pallas_call(
        functools.partial(_matmul_bn_kernel, relu=True, has_residual=False),
        out_shape=jax.ShapeDtypeStruct((Mp, width), jnp.bfloat16),
        grid_spec=pltpu.PrefetchScalarGridSpec(
            num_scalar_prefetch=0,
            grid=grid,
            in_specs=[
                pl.BlockSpec((tm, KP), lambda i, j, k: (i, j)),
                pl.BlockSpec((KP, TN), lambda i, j, k: (j, 0)),
                pl.BlockSpec((1, TN), lambda i, j, k: (0, j)),
                pl.BlockSpec((1, TN), lambda i, j, k: (0, j)),
            ],
            out_specs=pl.BlockSpec((tm, TN), lambda i, j, k: (i, j)),
            scratch_shapes=[pltpu.VMEM((tm, TN), jnp.float32)],
        ),
        compiler_params=pltpu.CompilerParams(
            dimension_semantics=("parallel", "parallel", "arbitrary"),
            vmem_limit_bytes=VMEM_LIMIT),
    )(a_p, b2, s_p, t_p)
    return out[:M]


# ----------------------------- pooling kernels -----------------------------

@jax.jit
def maxpool_3x3_s2_p1(x):
    n, h, w, c = x.shape
    ho = (h + 2 - 3) // 2 + 1
    wo = (w + 2 - 3) // 2 + 1
    xp = jnp.pad(x, ((0, 0), (1, 1), (1, 1), (0, 0)),
                 constant_values=-jnp.inf)
    views = []
    for i in range(3):
        for j in range(3):
            views.append(xp[:, i:i + 2 * (ho - 1) + 1:2,
                            j:j + 2 * (wo - 1) + 1:2, :])
    M = n * ho * wo
    stacked = jnp.stack(views, axis=0).reshape(9, M, c)
    tr = _choose_rows(M, 512)
    Mp = _round_up(M, tr)
    stacked = jnp.pad(stacked, ((0, 0), (0, Mp - M), (0, 0)),
                      constant_values=-jnp.inf)
    out = pl.pallas_call(
        _max9_kernel,
        out_shape=jax.ShapeDtypeStruct((Mp, c), x.dtype),
        grid_spec=pltpu.PrefetchScalarGridSpec(
            num_scalar_prefetch=0,
            grid=(Mp // tr,),
            in_specs=[pl.BlockSpec((9, tr, c), lambda i: (0, i, 0))],
            out_specs=pl.BlockSpec((tr, c), lambda i: (i, 0)),
        ),
        compiler_params=pltpu.CompilerParams(
            dimension_semantics=("parallel",),
            vmem_limit_bytes=VMEM_LIMIT),
    )(stacked)
    return out[:M].reshape(n, ho, wo, c)


@jax.jit
def global_avgpool(x):
    n, h, w, c = x.shape
    x3 = x.reshape(n, h * w, c)
    out = pl.pallas_call(
        _avgpool_kernel,
        out_shape=jax.ShapeDtypeStruct((n, 1, c), jnp.float32),
        grid_spec=pltpu.PrefetchScalarGridSpec(
            num_scalar_prefetch=0,
            grid=(n,),
            in_specs=[pl.BlockSpec((1, h * w, c), lambda i: (i, 0, 0))],
            out_specs=pl.BlockSpec((1, 1, c), lambda i: (i, 0, 0)),
        ),
        compiler_params=pltpu.CompilerParams(
            dimension_semantics=("parallel",),
            vmem_limit_bytes=VMEM_LIMIT),
    )(x3)
    return out.reshape(n, c)


# ----------------------------- conv glue -----------------------------

def _im2col(x, kh, kw, stride, pad):
    """NHWC -> (M, C*kh*kw) patches, channel-major / kernel-pos-minor layout."""
    n, h, w, c = x.shape
    ho = (h + 2 * pad - kh) // stride + 1
    wo = (w + 2 * pad - kw) // stride + 1
    xp = jnp.pad(x, ((0, 0), (pad, pad), (pad, pad), (0, 0)))
    cols = []
    for i in range(kh):
        for j in range(kw):
            cols.append(xp[:, i:i + stride * (ho - 1) + 1:stride,
                           j:j + stride * (wo - 1) + 1:stride, :])
    patches = jnp.stack(cols, axis=-1)              # (n, ho, wo, c, kh*kw)
    return patches.reshape(n * ho * wo, c * kh * kw), ho, wo


@functools.partial(jax.jit, static_argnames=("kh", "kw", "stride", "pad", "relu"))
def conv_kxk_bn_act(x, wmat, scale, shift, *, kh, kw, stride, pad, relu):
    a, ho, wo = _im2col(x, kh, kw, stride, pad)
    y = matmul_bn_act(a, wmat, scale, shift, relu=relu)
    return y.reshape(x.shape[0], ho, wo, -1)


def conv1x1_bn_act(x, wmat, scale, shift, *, stride=1, relu=True,
                   residual=None):
    if stride > 1:
        x = x[:, ::stride, ::stride, :]
    n, h, w, c = x.shape
    a = x.reshape(n * h * w, c)
    r = None
    if residual is not None:
        r = residual.reshape(n * h * w, residual.shape[-1])
    y = matmul_bn_act(a, wmat, scale, shift, r, relu=relu)
    return y.reshape(n, h, w, -1)


@functools.partial(jax.jit, static_argnames=("stride",))
def grouped_conv3x3_bn_relu(x, w3, scale, shift, *, stride):
    a, ho, wo = _im2col(x, 3, 3, stride, 1)
    y = grouped_matmul_bn_relu(a, w3, scale, shift)
    return y.reshape(x.shape[0], ho, wo, -1)


# ----------------------------- parameters -----------------------------

GROUPS = 32
WIDTH_PER_GROUP = 4
EXPANSION = 4
LAYER_CFG = [(3, 64, 1), (4, 128, 2), (6, 256, 2), (3, 512, 2)]
LANES = 128


class KeyGen:
    def __init__(self, seed):
        self._key = jax.random.PRNGKey(seed)

    def __call__(self):
        self._key, k = jax.random.split(self._key)
        return k


def _conv_weight(kg, cout, cin, kh, kw):
    fan_in = cin * kh * kw
    return (jax.random.normal(kg(), (cout, cin, kh, kw), jnp.float32)
            * np.sqrt(2.0 / fan_in)).astype(jnp.float32)


def _bn_scale_shift(kg, c, eps=1e-5):
    # Eval-mode BN folded into per-channel scale/shift (f32).
    gamma = 1.0 + 0.1 * jax.random.normal(kg(), (c,), jnp.float32)
    beta = 0.1 * jax.random.normal(kg(), (c,), jnp.float32)
    mean = 0.1 * jax.random.normal(kg(), (c,), jnp.float32)
    var = 1.0 + 0.1 * jax.random.uniform(kg(), (c,), jnp.float32)
    s = gamma / jnp.sqrt(var + eps)
    t = beta - mean * s
    return s, t


def _pack_dense(w):
    """(Cout, Cin, kh, kw) PyTorch weight -> (Cin*kh*kw, Cout) bf16,
    channel-major / kernel-pos-minor K layout (matches _im2col)."""
    cout, cin, kh, kw = w.shape
    return jnp.transpose(w, (1, 2, 3, 0)).reshape(cin * kh * kw,
                                                  cout).astype(jnp.bfloat16)


def _pack_grouped(w, groups, lanes=LANES):
    """(Cout, Cin/g, 3, 3) grouped weight -> (n_super, 9*lanes, lanes) packed
    block-diagonal super-group matrix.  P = lanes // (Cout/g) groups share one
    128-lane output tile, so zero-FLOPs are only Px (not Gx) the true grouped
    cost while every MXU tile stays lane-dense."""
    cout, cin_g, kh, kw = w.shape
    ng = cout // groups                 # output channels per group
    p = lanes // ng                     # groups packed per super-group
    n_super = cout // lanes
    assert lanes % ng == 0 and cout % lanes == 0 and p * cin_g == lanes
    w5 = w.reshape(n_super, p, ng, cin_g, kh * kw)
    wt = jnp.transpose(w5, (0, 1, 3, 4, 2))          # (s, p, cin_g, r, ng)
    eye = jnp.eye(p, dtype=w.dtype)
    packed = jnp.einsum('spcrn,pq->spcrqn', wt, eye)
    return packed.reshape(n_super, p * cin_g * kh * kw,
                          lanes).astype(jnp.bfloat16)


def init_params(num_classes, seed=0):
    # TODO(synk): pretrained timm weights cannot be loaded here; parameters are
    # deterministic synthetic (He-init conv weights, near-identity BN).
    kg = KeyGen(seed)
    params = {}
    params["stem_w"] = _pack_dense(_conv_weight(kg, 64, 3, 7, 7))
    params["stem_bn"] = _bn_scale_shift(kg, 64)

    inplanes = 64
    layers = []
    for blocks, planes, stride in LAYER_CFG:
        width = int(planes * (WIDTH_PER_GROUP / 64.0)) * GROUPS
        outplanes = planes * EXPANSION
        blks = []
        for b in range(blocks):
            s = stride if b == 0 else 1
            blk = {"stride": s}
            blk["conv1_w"] = _pack_dense(_conv_weight(kg, width, inplanes, 1, 1))
            blk["bn1"] = _bn_scale_shift(kg, width)
            blk["conv2_w"] = _pack_grouped(
                _conv_weight(kg, width, width // GROUPS, 3, 3), GROUPS)
            blk["bn2"] = _bn_scale_shift(kg, width)
            blk["conv3_w"] = _pack_dense(_conv_weight(kg, outplanes, width, 1, 1))
            blk["bn3"] = _bn_scale_shift(kg, outplanes)
            if b == 0:
                blk["ds_w"] = _pack_dense(
                    _conv_weight(kg, outplanes, inplanes, 1, 1))
                blk["ds_bn"] = _bn_scale_shift(kg, outplanes)
            blks.append(blk)
            inplanes = outplanes
        layers.append(blks)
    params["layers"] = layers

    fc = (jax.random.normal(kg(), (num_classes, 2048), jnp.float32)
          * np.sqrt(1.0 / 2048))
    params["fc_w"] = jnp.transpose(fc).astype(jnp.bfloat16)   # (2048, classes)
    params["fc_b"] = jnp.zeros((num_classes,), jnp.float32)
    return params


# ----------------------------- forward -----------------------------

def forward(params, x_nchw):
    # TODO(synk): BatchNorm uses eval-mode (running-stats) semantics only.
    x = jnp.transpose(x_nchw, (0, 2, 3, 1)).astype(jnp.bfloat16)  # NCHW->NHWC

    s, t = params["stem_bn"]
    x = conv_kxk_bn_act(x, params["stem_w"], s, t,
                        kh=7, kw=7, stride=2, pad=3, relu=True)
    x = maxpool_3x3_s2_p1(x)

    for blks in params["layers"]:
        for blk in blks:
            identity = x
            s1, t1 = blk["bn1"]
            out = conv1x1_bn_act(x, blk["conv1_w"], s1, t1,
                                 stride=1, relu=True)
            s2, t2 = blk["bn2"]
            out = grouped_conv3x3_bn_relu(out, blk["conv2_w"], s2, t2,
                                          stride=blk["stride"])
            if "ds_w" in blk:
                sd, td = blk["ds_bn"]
                identity = conv1x1_bn_act(x, blk["ds_w"], sd, td,
                                          stride=blk["stride"], relu=False)
            s3, t3 = blk["bn3"]
            # conv3 + BN + residual add + ReLU fused in one matmul epilogue.
            x = conv1x1_bn_act(out, blk["conv3_w"], s3, t3,
                               stride=1, relu=True, residual=identity)

    x = global_avgpool(x)                                      # (N, 2048) f32
    ones = jnp.ones((params["fc_b"].shape[0],), jnp.float32)
    logits = matmul_bn_act(x, params["fc_w"], ones, params["fc_b"],
                           relu=False, out_dtype=jnp.float32)
    return logits


if __name__ == "__main__":
    num_classes = 10
    params = init_params(num_classes, seed=0)

    key = jax.random.PRNGKey(0)
    x = jax.random.normal(key, (2, 3, 32, 32), jnp.float32)    # NCHW like PyTorch

    logits = forward(params, x)
    logits = jax.block_until_ready(logits)

    assert logits.shape == (2, num_classes), logits.shape
    assert bool(jnp.all(jnp.isfinite(logits)))
    print("KERNEL_OK")
</pallas_src>

<mosaic_0001>
module attributes {stable_mosaic.version = 11 : i64} {
  func.func @_matmul_bn_kernel(%arg0: i32, %arg1: i32, %arg2: i32, %arg3: memref<256x256xbf16, #tpu.memory_space<vmem>>, %arg4: memref<256x128xbf16, #tpu.memory_space<vmem>>, %arg5: memref<1x128xf32, #tpu.memory_space<vmem>>, %arg6: memref<1x128xf32, #tpu.memory_space<vmem>>, %arg7: memref<256x128xbf16, #tpu.memory_space<vmem>>, %arg8: memref<256x128xf32, #tpu.memory_space<vmem>>) attributes {dimension_semantics = [#tpu.dimension_semantics<parallel>, #tpu.dimension_semantics<parallel>, #tpu.dimension_semantics<arbitrary>], iteration_bounds = array<i64: 2, 1, 1>, scalar_prefetch = 0 : i64, scratch_operands = 1 : i64, tpu.core_type = #tpu.core_type<tc>, window_params = [{transform_indices = @transform_0, window_bounds = array<i64: 256, 256>}, {transform_indices = @transform_1, window_bounds = array<i64: 256, 128>}, {transform_indices = @transform_2, window_bounds = array<i64: 1, 128>}, {transform_indices = @transform_3, window_bounds = array<i64: 1, 128>}, {transform_indices = @transform_4, window_bounds = array<i64: 256, 128>}]} {
    %c0_i32 = arith.constant 0 : i32
    %0 = arith.cmpi eq, %arg2, %c0_i32 : i32
    %1 = arith.extui %0 : i1 to i32
    %c0_i32_0 = arith.constant 0 : i32
    %2 = arith.cmpi ne, %1, %c0_i32_0 : i32
    scf.if %2 {
      %cst_10 = arith.constant 0.000000e+00 : f32
      %12 = vector.broadcast %cst_10 : f32 to vector<256x128xf32>
      %c0_11 = arith.constant 0 : index
      %c0_12 = arith.constant 0 : index
      %13 = vector.load %arg8[%c0_11, %c0_12] : memref<256x128xf32, #tpu.memory_space<vmem>>, vector<256x128xf32>
      tpu.vector_store %arg8[%c0_11, %c0_12], %12 {strides = array<i32>} : memref<256x128xf32, #tpu.memory_space<vmem>>, vector<256x128xf32>,
    } else {
    }
    %c0 = arith.constant 0 : index
    %c0_1 = arith.constant 0 : index
    %3 = vector.load %arg8[%c0, %c0_1] : memref<256x128xf32, #tpu.memory_space<vmem>>, vector<256x128xf32>
    %c0_2 = arith.constant 0 : index
    %c0_3 = arith.constant 0 : index
    %4 = vector.load %arg3[%c0_2, %c0_3] : memref<256x256xbf16, #tpu.memory_space<vmem>>, vector<256x256xbf16>
    %c0_4 = arith.constant 0 : index
    %c0_5 = arith.constant 0 : index
    %5 = vector.load %arg4[%c0_4, %c0_5] : memref<256x128xbf16, #tpu.memory_space<vmem>>, vector<256x128xbf16>
    %cst = arith.constant dense<0.000000e+00> : vector<256x128xf32>
    %6 = tpu.matmul %4, %5, %cst {dimension_numbers = #tpu.dot_dimension_numbers<[1], [0], [0], [1], [0, 0, 1, 1], [], []>} : vector<256x256xbf16>, vector<256x128xbf16>, vector<256x128xf32> -> vector<256x128xf32>
    %7 = arith.addf %3, %6 : vector<256x128xf32>
    %c0_6 = arith.constant 0 : index
    %c0_7 = arith.constant 0 : index
    %8 = vector.load %arg8[%c0_6, %c0_7] : memref<256x128xf32, #tpu.memory_space<vmem>>, vector<256x128xf32>
    tpu.vector_store %arg8[%c0_6, %c0_7], %7 {strides = array<i32>} : memref<256x128xf32, #tpu.memory_space<vmem>>, vector<256x128xf32>,
    %c0_i32_8 = arith.constant 0 : i32
    %9 = arith.cmpi eq, %arg2, %c0_i32_8 : i32
    %10 = arith.extui %9 : i1 to i32
    %c0_i32_9 = arith.constant 0 : i32
    %11 = arith.cmpi ne, %10, %c0_i32_9 : i32
    scf.if %11 {
      %c0_10 = arith.constant 0 : index
      %c0_11 = arith.constant 0 : index
      %12 = vector.load %arg8[%c0_10, %c0_11] : memref<256x128xf32, #tpu.memory_space<vmem>>, vector<256x128xf32>
      %c0_12 = arith.constant 0 : index
      %c0_13 = arith.constant 0 : index
      %13 = vector.load %arg5[%c0_12, %c0_13] : memref<1x128xf32, #tpu.memory_space<vmem>>, vector<1x128xf32>
      %14 = vector.broadcast %13 : vector<1x128xf32> to vector<256x128xf32>
      %15 = arith.mulf %12, %14 : vector<256x128xf32>
      %c0_14 = arith.constant 0 : index
      %c0_15 = arith.constant 0 : index
      %16 = vector.load %arg6[%c0_14, %c0_15] : memref<1x128xf32, #tpu.memory_space<vmem>>, vector<1x128xf32>
      %17 = vector.broadcast %16 : vector<1x128xf32> to vector<256x128xf32>
      %18 = arith.addf %15, %17 : vector<256x128xf32>
      %cst_16 = arith.constant 0.000000e+00 : f32
      %19 = vector.broadcast %cst_16 : f32 to vector<256x128xf32>
      %20 = arith.maximumf %18, %19 : vector<256x128xf32>
      %21 = arith.truncf %20 : vector<256x128xf32> to vector<256x128xbf16>
      %c0_17 = arith.constant 0 : index
      %c0_18 = arith.constant 0 : index
      %22 = vector.load %arg7[%c0_17, %c0_18] : memref<256x128xbf16, #tpu.memory_space<vmem>>, vector<256x128xbf16>
      tpu.vector_store %arg7[%c0_17, %c0_18], %21 {strides = array<i32>} : memref<256x128xbf16, #tpu.memory_space<vmem>>, vector<256x128xbf16>,
    } else {
    }
    return
  }
  func.func @transform_0(%arg0: i32, %arg1: i32, %arg2: i32) -> (i32, i32) {
    %c0_i32 = arith.constant 0 : i32
    return %arg0, %arg2 : i32, i32
  }
  func.func @transform_1(%arg0: i32, %arg1: i32, %arg2: i32) -> (i32, i32) {
    %c0_i32 = arith.constant 0 : i32
    return %arg2, %arg1 : i32, i32
  }
  func.func @transform_2(%arg0: i32, %arg1: i32, %arg2: i32) -> (i32, i32) {
    %c0_i32 = arith.constant 0 : i32
    %c0_i32_0 = arith.constant 0 : i32
    return %c0_i32, %arg1 : i32, i32
  }
  func.func @transform_3(%arg0: i32, %arg1: i32, %arg2: i32) -> (i32, i32) {
    %c0_i32 = arith.constant 0 : i32
    %c0_i32_0 = arith.constant 0 : i32
    return %c0_i32, %arg1 : i32, i32
  }
  func.func @transform_4(%arg0: i32, %arg1: i32, %arg2: i32) -> (i32, i32) {
    %c0_i32 = arith.constant 0 : i32
    return %arg0, %arg1 : i32, i32
  }
}

</mosaic_0001>

<bundles_post_ra>
// kernel: matmul_bn_act.1
= control target key start
LH: loop header
LB: loop body
LE: loop exit
PB: predicated region body
PF: predicated region fallthrough
CT: control target
= control target key end

     0   :  { %s1709_s15 = smov 0   ;;  %s1711_s16 = smov 0   ;;  %s1955_s0 = inlined_call_operand.vmem [shape: bf16[512,256], index: 0, kind: input, shape index: {}]   ;;  %s1956_s1 = inlined_call_operand.vmem [shape: bf16[256,128], index: 1, kind: input, shape index: {}]   ;;  %s1957_s2 = inlined_call_operand.vmem [shape: f32[1,128], index: 2, kind: input, shape index: {}]   ;;  %s1958_s3 = inlined_call_operand.vmem [shape: f32[1,128], index: 3, kind: input, shape index: {}]   ;;  %s1959_s4 = inlined_call_operand.vmem [shape: bf16[512,128], index: 4, kind: output, shape index: {}]  }
   0x1   :  { %s1713_s17 = smov 0  }
   0x2 LB: > { %s33_s18 = sadd.s32 1, %s1678_s16  ;;  %p1274_p0 = scmp.ge.s32.totalorder %s1682_s17, 1  ;;  %s1682_s17 = sphi %s1713_s17, %s14_s17   ;;  %s1678_s16 = sphi %s1711_s16, %s1961_s16   ;;  %s1674_s15 = sphi %s1709_s15, %s1960_s15  }
   0x3   : > { %p35_p1 = scmp.ge.s32.totalorder %s33_s18, 2  ;;  %p224_p2 = scmp.lt.s32.totalorder %s1682_s17, 3 }
   0x5   : > { %s1963_s18 = smov (%p35_p1, %s33_s18), 0  ;;  %p225_p3 = pnand %p1274_p0, %p224_p2 }
   0x6   : > { %s1275_s5 = sshll.u32 (!%p225_p3), %s1674_s15, 5 }
   0x7   : > { %228 = sbr.rel (%p225_p3) target bundleno = 308 (0x134), region = 36  ;;  %p274_p4 = scmp.lt.s32.totalorder (!%p225_p3), %s1275_s5, 63 }
   0xc   : > { %v1514_v0 = vld [vmem:[%s1956_s1 + $0x38] sm:$0xff]  ;;  %v1513_v2 = vld [vmem:[%s1956_s1 + $0x30] sm:$0xff]  ;;  %v1512_v4 = vld [vmem:[%s1956_s1 + $0x28] sm:$0xff]  ;;  %s1965_s5 = smov (!%p274_p4, %s1275_s5), 63 }
   0xd   : > { %v1522_v1 = vld [vmem:[%s1956_s1 + $0x78] sm:$0xff]  ;;  %696 = vmatpush.bf16.msra.mxu0 %v1514_v0  ;;  %1618 = vmatpush.bf16.msra.mxu2 %v1514_v0  ;;  %v1521_v3 = vld [vmem:[%s1956_s1 + $0x70] sm:$0xff]  ;;  %v1520_v5 = vld [vmem:[%s1956_s1 + $0x68] sm:$0xff]  ;;  %s1474_s21 = sshll.u32 %s1965_s5, 3  ;;  %s1279_s12 = sshll.u32 %s1965_s5, 2 }
   0xe   : > { %785 = vmatpush.bf16.msra.mxu1 %v1522_v1  ;;  %1626 = vmatpush.bf16.msra.mxu3 %v1522_v1  ;;  %v1511_v6 = vld [vmem:[%s1956_s1 + $0x20] sm:$0xff]  ;;  %v1510_v8 = vld [vmem:[%s1956_s1 + $0x18] sm:$0xff]  ;;  %v1509_v10 = vld [vmem:[%s1956_s1 + $0x10] sm:$0xff]  ;;  %s1775_s26 = scalar_lea.vmem %s1955_s0, %s1474_s21  ;;  %s1869_s15 = scalar_lea.vmem %s1959_s4, %s1279_s12 }
   0xf   : > { %v1519_v7 = vld [vmem:[%s1956_s1 + $0x60] sm:$0xff]  ;;  %v1518_v9 = vld [vmem:[%s1956_s1 + $0x58] sm:$0xff]  ;;  %v1517_v11 = vld [vmem:[%s1956_s1 + $0x50] sm:$0xff] }
  0x10   : > { %v1508_v12 = vld [vmem:[%s1956_s1 + $0x8] sm:$0xff]  ;;  %v1507_v14 = vld [vmem:[%s1956_s1] sm:$0xff]  ;;  %v1290_v28 = vld [vmem:[%s1775_s26 + $0x10] sm:$0xf] }
  0x11   : > { %697 = vmatpush.bf16.msra.mxu0 %v1513_v2  ;;  %1619 = vmatpush.bf16.msra.mxu2 %v1513_v2  ;;  %v1516_v13 = vld [vmem:[%s1956_s1 + $0x48] sm:$0xff]  ;;  %v1515_v15 = vld [vmem:[%s1956_s1 + $0x40] sm:$0xff]  ;;  %v1478_v29 = vld [vmem:[%s1775_s26 + $0x14] sm:$0xf0] }
  0x12   : > { %786 = vmatpush.bf16.msra.mxu1 %v1521_v3  ;;  %1627 = vmatpush.bf16.msra.mxu3 %v1521_v3  ;;  %v1282_v16 = vld [vmem:[%s1775_s26] sm:$0xf]  ;;  %v1476_v17 = vld [vmem:[%s1775_s26 + $0x4] sm:$0xf0]  ;;  %v1475_v20 = vld [vmem:[%s1775_s26 + $0x4] sm:$0xf]  ;;  %v1291_v36 = vor.u32 %v1478_v29, %v1290_v28 }
  0x13   : > { %v1346_v18 = vld [vmem:[%s1775_s26 + $0x80] sm:$0xf]  ;;  %v1492_v19 = vld [vmem:[%s1775_s26 + $0x84] sm:$0xf0]  ;;  %v1284_v21 = vld [vmem:[%s1775_s26 + $0x8] sm:$0xf0]  ;;  %v1283_v24 = vor.u32 %v1476_v17, %v1282_v16 }
  0x14   : > { %v1491_v22 = vld [vmem:[%s1775_s26 + $0x84] sm:$0xf]  ;;  %v1348_v23 = vld [vmem:[%s1775_s26 + $0x88] sm:$0xf0]  ;;  %v1347_v25 = vor.u32 %v1492_v19, %v1346_v18  ;;  %v1287_v26 = vor.u32 %v1475_v20, %v1284_v21  ;;  %v1354_v30 = vld [vmem:[%s1775_s26 + $0x90] sm:$0xf] }
  0x15   : > { %698 = vmatpush.bf16.msra.mxu0 %v1512_v4  ;;  %1620 = vmatpush.bf16.msra.mxu2 %v1512_v4  ;;  %v1351_v27 = vor.u32 %v1491_v22, %v1348_v23  ;;  %v1494_v31 = vld [vmem:[%s1775_s26 + $0x94] sm:$0xf0]  ;;  %v1477_v32 = vld [vmem:[%s1775_s26 + $0x14] sm:$0xf]  ;;  %v1292_v33 = vld [vmem:[%s1775_s26 + $0x18] sm:$0xf0] }
  0x16   : > { %787 = vmatpush.bf16.msra.mxu1 %v1520_v5  ;;  %1628 = vmatpush.bf16.msra.mxu3 %v1520_v5  ;;  %v1493_v34 = vld [vmem:[%s1775_s26 + $0x94] sm:$0xf]  ;;  %v1356_v35 = vld [vmem:[%s1775_s26 + $0x98] sm:$0xf0]  ;;  %v1355_v37 = vor.u32 %v1494_v31, %v1354_v30  ;;  %v1295_v38 = vor.u32 %v1477_v32, %v1292_v33  ;;  %v1298_v40 = vld [vmem:[%s1775_s26 + $0x20] sm:$0xf] }
  0x17   : > { %v1359_v39 = vor.u32 %v1493_v34, %v1356_v35  ;;  %v1480_v41 = vld [vmem:[%s1775_s26 + $0x24] sm:$0xf0]  ;;  %v1362_v42 = vld [vmem:[%s1775_s26 + $0xa0] sm:$0xf]  ;;  %v1479_v44 = vld [vmem:[%s1775_s26 + $0x24] sm:$0xf] }
  0x18   : > { %v1496_v43 = vld [vmem:[%s1775_s26 + $0xa4] sm:$0xf0]  ;;  %v1300_v45 = vld [vmem:[%s1775_s26 + $0x28] sm:$0xf0]  ;;  %v1495_v46 = vld [vmem:[%s1775_s26 + $0xa4] sm:$0xf]  ;;  %v1299_v48 = vor.u32 %v1480_v41, %v1298_v40 }
  0x19   : > { %699 = vmatpush.bf16.msra.mxu0 %v1511_v6  ;;  %1621 = vmatpush.bf16.msra.mxu2 %v1511_v6  ;;  %v1364_v47 = vld [vmem:[%s1775_s26 + $0xa8] sm:$0xf0]  ;;  %v1363_v49 = vor.u32 %v1496_v43, %v1362_v42  ;;  %v1303_v50 = vor.u32 %v1479_v44, %v1300_v45  ;;  %v1306_v52 = vld [vmem:[%s1775_s26 + $0x30] sm:$0xf]  ;;  %v1482_v53 = vld [vmem:[%s1775_s26 + $0x34] sm:$0xf0] }
  0x1a   : > { %788 = vmatpush.bf16.msra.mxu1 %v1519_v7  ;;  %1629 = vmatpush.bf16.msra.mxu3 %v1519_v7  ;;  %v1367_v51 = vor.u32 %v1495_v46, %v1364_v47  ;;  %v1370_v54 = vld [vmem:[%s1775_s26 + $0xb0] sm:$0xf]  ;;  %v1498_v55 = vld [vmem:[%s1775_s26 + $0xb4] sm:$0xf0]  ;;  %v1481_v56 = vld [vmem:[%s1775_s26 + $0x34] sm:$0xf]  ;;  %v1307_v60 = vor.u32 %v1482_v53, %v1306_v52 }
  0x1b   : > { %v1308_v57 = vld [vmem:[%s1775_s26 + $0x38] sm:$0xf0]  ;;  %v1497_v58 = vld [vmem:[%s1775_s26 + $0xb4] sm:$0xf]  ;;  %v1371_v61 = vor.u32 %v1498_v55, %v1370_v54  ;;  %v1314_v0 = vld [vmem:[%s1775_s26 + $0x40] sm:$0xf] }
  0x1c   : > { %v1372_v59 = vld [vmem:[%s1775_s26 + $0xb8] sm:$0xf0]  ;;  %v1311_v62 = vor.u32 %v1481_v56, %v1308_v57  ;;  %v1484_v1 = vld [vmem:[%s1775_s26 + $0x44] sm:$0xf0]  ;;  %v1378_v2 = vld [vmem:[%s1775_s26 + $0xc0] sm:$0xf] }
  0x1d   : > { %700 = vmatpush.bf16.msra.mxu0 %v1510_v8  ;;  %1622 = vmatpush.bf16.msra.mxu2 %v1510_v8  ;;  %v1375_v63 = vor.u32 %v1497_v58, %v1372_v59  ;;  %v1500_v3 = vld [vmem:[%s1775_s26 + $0xc4] sm:$0xf0]  ;;  %v1483_v4 = vld [vmem:[%s1775_s26 + $0x44] sm:$0xf]  ;;  %v1316_v5 = vld [vmem:[%s1775_s26 + $0x48] sm:$0xf0]  ;;  %v1315_v8 = vor.u32 %v1484_v1, %v1314_v0 }
  0x1e   : > { %789 = vmatpush.bf16.msra.mxu1 %v1518_v9  ;;  %1630 = vmatpush.bf16.msra.mxu3 %v1518_v9  ;;  %v1499_v6 = vld [vmem:[%s1775_s26 + $0xc4] sm:$0xf]  ;;  %v1380_v7 = vld [vmem:[%s1775_s26 + $0xc8] sm:$0xf0]  ;;  %v1379_v9 = vor.u32 %v1500_v3, %v1378_v2  ;;  %v1485_v16 = vld [vmem:[%s1775_s26 + $0x54] sm:$0xf] }
  0x1f   : > { %v1324_v17 = vld [vmem:[%s1775_s26 + $0x58] sm:$0xf0]  ;;  %v1501_v18 = vld [vmem:[%s1775_s26 + $0xd4] sm:$0xf]  ;;  %v1487_v28 = vld [vmem:[%s1775_s26 + $0x64] sm:$0xf] }
  0x20   : > { %v1388_v19 = vld [vmem:[%s1775_s26 + $0xd8] sm:$0xf0]  ;;  %v1327_v22 = vor.u32 %v1485_v16, %v1324_v17  ;;  %v1332_v29 = vld [vmem:[%s1775_s26 + $0x68] sm:$0xf0]  ;;  %v1503_v30 = vld [vmem:[%s1775_s26 + $0xe4] sm:$0xf] }
  0x21   : > { %701 = vmatpush.bf16.msra.mxu0 %v1509_v10  ;;  %1623 = vmatpush.bf16.msra.mxu2 %v1509_v10  ;;  %v1319_v10 = vor.u32 %v1483_v4, %v1316_v5  ;;  %v1391_v23 = vor.u32 %v1501_v18, %v1388_v19  ;;  %v1396_v31 = vld [vmem:[%s1775_s26 + $0xe8] sm:$0xf0]  ;;  %v1335_v34 = vor.u32 %v1487_v28, %v1332_v29  ;;  %v1489_v40 = vld [vmem:[%s1775_s26 + $0x74] sm:$0xf]  ;;  %v1340_v41 = vld [vmem:[%s1775_s26 + $0x78] sm:$0xf0] }
  0x22   : > { %790 = vmatpush.bf16.msra.mxu1 %v1517_v11  ;;  %1631 = vmatpush.bf16.msra.mxu3 %v1517_v11  ;;  %v1383_v11 = vor.u32 %v1499_v6, %v1380_v7  ;;  %v1399_v35 = vor.u32 %v1503_v30, %v1396_v31  ;;  %v1505_v42 = vld [vmem:[%s1775_s26 + $0xf4] sm:$0xf]  ;;  %v1404_v43 = vld [vmem:[%s1775_s26 + $0xf8] sm:$0xf0]  ;;  %v1343_v46 = vor.u32 %v1489_v40, %v1340_v41  ;;  %v1859_v55 = vld [vmem:[%s1958_s3] ss:$0 sm:$0xff] }
  0x23   : > { %v1407_v47 = vor.u32 %v1505_v42, %v1404_v43 }
  0x25   : > { %702 = vmatpush.bf16.msra.mxu0 %v1508_v12  ;;  %1624 = vmatpush.bf16.msra.mxu2 %v1508_v12  ;;  %v1322_v12 = vld [vmem:[%s1775_s26 + $0x50] sm:$0xf] }
  0x26   : > { %791 = vmatpush.bf16.msra.mxu1 %v1516_v13  ;;  %1632 = vmatpush.bf16.msra.mxu3 %v1516_v13  ;;  %v1486_v13 = vld [vmem:[%s1775_s26 + $0x54] sm:$0xf0] }
  0x27   : > { %v1323_v20 = vor.u32 %v1486_v13, %v1322_v12 }
  0x29   : > { %703 = vmatpush.bf16.msra.mxu0 %v1507_v14  ;;  %1625 = vmatpush.bf16.msra.mxu2 %v1507_v14  ;;  %v1386_v14 = vld [vmem:[%s1775_s26 + $0xd0] sm:$0xf] }
  0x2a   : > { %792 = vmatpush.bf16.msra.mxu1 %v1515_v15  ;;  %1633 = vmatpush.bf16.msra.mxu3 %v1515_v15  ;;  %v1502_v15 = vld [vmem:[%s1775_s26 + $0xd4] sm:$0xf0] }
  0x2b   : > { %v1387_v21 = vor.u32 %v1502_v15, %v1386_v14 }
  0x2c   : > { %704 = vmatmul.bf16.vlgmr.msra.gmra.mxu0 %v1283_v24  ;;  %744 = vmatmul.bf16.vlgmr.msra.gmra.mxu2 %v1347_v25  ;;  %v1330_v24 = vld [vmem:[%s1775_s26 + $0x60] sm:$0xf]  ;;  %v1488_v25 = vld [vmem:[%s1775_s26 + $0x64] sm:$0xf0] }
  0x2d   : > { %793 = vmatmul.bf16.vlgmr.msra.gmra.mxu1 %v1287_v26  ;;  %833 = vmatmul.bf16.vlgmr.msra.gmra.mxu3 %v1351_v27  ;;  %v1394_v26 = vld [vmem:[%s1775_s26 + $0xe0] sm:$0xf]  ;;  %v1504_v27 = vld [vmem:[%s1775_s26 + $0xe4] sm:$0xf0]  ;;  %v1331_v32 = vor.u32 %v1488_v25, %v1330_v24 }
  0x2e   : > { %v1395_v33 = vor.u32 %v1504_v27, %v1394_v26 }
  0x3c   : > { %709 = vmatmul.bf16.gmra.mxu0 %v1291_v36  ;;  %749 = vmatmul.bf16.gmra.mxu2 %v1355_v37  ;;  %v1338_v36 = vld [vmem:[%s1775_s26 + $0x70] sm:$0xf]  ;;  %v1490_v37 = vld [vmem:[%s1775_s26 + $0x74] sm:$0xf0] }
  0x3d   : > { %798 = vmatmul.bf16.gmra.mxu1 %v1295_v38  ;;  %838 = vmatmul.bf16.gmra.mxu3 %v1359_v39  ;;  %v1402_v38 = vld [vmem:[%s1775_s26 + $0xf0] sm:$0xf]  ;;  %v1506_v39 = vld [vmem:[%s1775_s26 + $0xf4] sm:$0xf0]  ;;  %v1339_v44 = vor.u32 %v1490_v37, %v1338_v36 }
  0x3e   : > { %v1403_v45 = vor.u32 %v1506_v39, %v1402_v38 }
  0x4c   : > { %714 = vmatmul.bf16.gmra.mxu0 %v1299_v48  ;;  %754 = vmatmul.bf16.gmra.mxu2 %v1363_v49 }
  0x4d   : > { %803 = vmatmul.bf16.gmra.mxu1 %v1303_v50  ;;  %843 = vmatmul.bf16.gmra.mxu3 %v1367_v51  ;;  %v1853_v51 = vld [vmem:[%s1957_s2] ss:$0 sm:$0xff] }
  0x5c   : > { %719 = vmatmul.bf16.gmra.mxu0 %v1307_v60  ;;  %759 = vmatmul.bf16.gmra.mxu2 %v1371_v61 }
  0x5d   : > { %808 = vmatmul.bf16.gmra.mxu1 %v1311_v62  ;;  %848 = vmatmul.bf16.gmra.mxu3 %v1375_v63 }
  0x6c   : > { %724 = vmatmul.bf16.gmra.mxu0 %v1315_v8  ;;  %764 = vmatmul.bf16.gmra.mxu2 %v1379_v9 }
  0x6d   : > { %813 = vmatmul.bf16.gmra.mxu1 %v1319_v10  ;;  %853 = vmatmul.bf16.gmra.mxu3 %v1383_v11 }
  0x7c   : > { %729 = vmatmul.bf16.gmra.mxu0 %v1323_v20  ;;  %769 = vmatmul.bf16.gmra.mxu2 %v1387_v21 }
  0x7d   : > { %818 = vmatmul.bf16.gmra.mxu1 %v1327_v22  ;;  %858 = vmatmul.bf16.gmra.mxu3 %v1391_v23 }
  0x8c   : > { %734 = vmatmul.bf16.gmra.mxu0 %v1331_v32  ;;  %774 = vmatmul.bf16.gmra.mxu2 %v1395_v33 }
  0x8d   : > { %823 = vmatmul.bf16.gmra.mxu1 %v1335_v34  ;;  %863 = vmatmul.bf16.gmra.mxu3 %v1399_v35 }
  0x9c   : > { %739 = vmatmul.bf16.gmra.mxu0 %v1339_v44  ;;  %779 = vmatmul.bf16.gmra.mxu2 %v1403_v45 }
  0x9d   : > { %828 = vmatmul.bf16.gmra.mxu1 %v1343_v46  ;;  %868 = vmatmul.bf16.gmra.mxu3 %v1407_v47 }
  0xa9   : > { %v705_v48 = vpop.f32.mrf.mxu0 }
  0xaa   : > { %v794_v49 = vpop.f32.mrf.mxu1 }
  0xab   : > { %v795_v50 = vadd.f32 %v794_v49, %v705_v48 }
  0xad   : > { %v977_v54 = vmul.f32 %v1853_v51, %v795_v50 }
  0xaf   : > { %v745_v52 = vpop.f32.mrf.mxu2  ;;  %v1013_v60 = vadd.f32 %v1859_v55, %v977_v54 }
  0xb0   : > { %v834_v53 = vpop.f32.mrf.mxu3 }
  0xb1   : > { %v707_v56 = vpop.f32.mrf.mxu0  ;;  %v835_v58 = vadd.f32 %v834_v53, %v745_v52  ;;  %v1045_v2 = vmax.f32 %v1013_v60, 0.0 }
  0xb2   : > { %v796_v57 = vpop.f32.mrf.mxu1 }
  0xb3   : > { %v797_v59 = vadd.f32 %v796_v57, %v707_v56  ;;  %v993_v62 = vmul.f32 %v1853_v51, %v835_v58 }
  0xb5   : > { %v978_v61 = vmul.f32 %v1853_v51, %v797_v59  ;;  %v1029_v7 = vadd.f32 %v1859_v55, %v993_v62 }
  0xb7   : > { %v1014_v63 = vadd.f32 %v1859_v55, %v978_v61  ;;  %v747_v0 = vpop.f32.mrf.mxu2  ;;  %v1061_v12 = vmax.f32 %v1029_v7, 0.0 }
  0xb8   : > { %v836_v1 = vpop.f32.mrf.mxu3 }
  0xb9   : > { %v1046_v3 = vmax.f32 %v1014_v63, 0.0  ;;  %v837_v4 = vadd.f32 %v836_v1, %v747_v0  ;;  %v710_v5 = vpop.f32.mrf.mxu0 }
  0xba   : > { %v799_v6 = vpop.f32.mrf.mxu1 }
  0xbb   : > { %v1526_v8 = vpack.c.bf16 %v1046_v3, %v1045_v2  ;;  %v994_v9 = vmul.f32 %v1853_v51, %v837_v4  ;;  %v800_v11 = vadd.f32 %v799_v6, %v710_v5 }
  0xbd   : > { %1527 = vst [vmem:[%s1869_s15] sm:$0xff] %v1526_v8   ;;  %v1030_v10 = vadd.f32 %v1859_v55, %v994_v9  ;;  %v979_v17 = vmul.f32 %v1853_v51, %v800_v11 }
  0xbf   : > { %v1062_v13 = vmax.f32 %v1030_v10, 0.0  ;;  %v750_v14 = vpop.f32.mrf.mxu2  ;;  %v1015_v22 = vadd.f32 %v1859_v55, %v979_v17 }
  0xc0   : > { %v839_v15 = vpop.f32.mrf.mxu3 }
  0xc1   : > { %v1566_v16 = vpack.c.bf16 %v1062_v13, %v1061_v12  ;;  %v712_v18 = vpop.f32.mrf.mxu0  ;;  %v840_v20 = vadd.f32 %v839_v15, %v750_v14  ;;  %v1047_v28 = vmax.f32 %v1015_v22, 0.0 }
  0xc2   : > { %v801_v19 = vpop.f32.mrf.mxu1 }
  0xc3   : > { %1610 = vst [vmem:[%s1869_s15 + $0x40] sm:$0xff] %v1566_v16   ;;  %v802_v21 = vadd.f32 %v801_v19, %v712_v18  ;;  %v995_v24 = vmul.f32 %v1853_v51, %v840_v20 }
  0xc5   : > { %v980_v23 = vmul.f32 %v1853_v51, %v802_v21  ;;  %v1031_v33 = vadd.f32 %v1859_v55, %v995_v24 }
  0xc7   : > { %v1016_v25 = vadd.f32 %v1859_v55, %v980_v23  ;;  %v752_v26 = vpop.f32.mrf.mxu2  ;;  %v1063_v38 = vmax.f32 %v1031_v33, 0.0 }
  0xc8   : > { %v841_v27 = vpop.f32.mrf.mxu3 }
  0xc9   : > { %v1048_v29 = vmax.f32 %v1016_v25, 0.0  ;;  %v842_v30 = vadd.f32 %v841_v27, %v752_v26  ;;  %v715_v31 = vpop.f32.mrf.mxu0 }
  0xca   : > { %v804_v32 = vpop.f32.mrf.mxu1 }
  0xcb   : > { %v1531_v34 = vpack.c.bf16 %v1048_v29, %v1047_v28  ;;  %v996_v35 = vmul.f32 %v1853_v51, %v842_v30  ;;  %v805_v37 = vadd.f32 %v804_v32, %v715_v31 }
  0xcd   : > { %1603 = vst [vmem:[%s1869_s15 + $0x8] sm:$0xff] %v1531_v34   ;;  %v1032_v36 = vadd.f32 %v1859_v55, %v996_v35  ;;  %v981_v43 = vmul.f32 %v1853_v51, %v805_v37 }
  0xcf   : > { %v1064_v39 = vmax.f32 %v1032_v36, 0.0  ;;  %v755_v40 = vpop.f32.mrf.mxu2  ;;  %v1017_v48 = vadd.f32 %v1859_v55, %v981_v43 }
  0xd0   : > { %v844_v41 = vpop.f32.mrf.mxu3 }
  0xd1   : > { %v1571_v42 = vpack.c.bf16 %v1064_v39, %v1063_v38  ;;  %v717_v44 = vpop.f32.mrf.mxu0  ;;  %v845_v46 = vadd.f32 %v844_v41, %v755_v40  ;;  %v1049_v56 = vmax.f32 %v1017_v48, 0.0 }
  0xd2   : > { %v806_v45 = vpop.f32.mrf.mxu1 }
  0xd3   : > { %1611 = vst [vmem:[%s1869_s15 + $0x48] sm:$0xff] %v1571_v42   ;;  %v807_v47 = vadd.f32 %v806_v45, %v717_v44  ;;  %v997_v50 = vmul.f32 %v1853_v51, %v845_v46 }
  0xd5   : > { %v982_v49 = vmul.f32 %v1853_v51, %v807_v47  ;;  %v1033_v61 = vadd.f32 %v1859_v55, %v997_v50 }
  0xd7   : > { %v1018_v52 = vadd.f32 %v1859_v55, %v982_v49  ;;  %v757_v53 = vpop.f32.mrf.mxu2  ;;  %v1065_v2 = vmax.f32 %v1033_v61, 0.0 }
  0xd8   : > { %v846_v54 = vpop.f32.mrf.mxu3 }
  0xd9   : > { %v1050_v57 = vmax.f32 %v1018_v52, 0.0  ;;  %v847_v58 = vadd.f32 %v846_v54, %v757_v53  ;;  %v720_v59 = vpop.f32.mrf.mxu0 }
  0xda   : > { %v809_v60 = vpop.f32.mrf.mxu1 }
  0xdb   : > { %v1536_v62 = vpack.c.bf16 %v1050_v57, %v1049_v56  ;;  %v998_v63 = vmul.f32 %v1853_v51, %v847_v58  ;;  %v810_v1 = vadd.f32 %v809_v60, %v720_v59 }
  0xdd   : > { %1604 = vst [vmem:[%s1869_s15 + $0x10] sm:$0xff] %v1536_v62   ;;  %v1034_v0 = vadd.f32 %v1859_v55, %v998_v63  ;;  %v983_v7 = vmul.f32 %v1853_v51, %v810_v1 }
  0xdf   : > { %v1066_v3 = vmax.f32 %v1034_v0, 0.0  ;;  %v760_v4 = vpop.f32.mrf.mxu2  ;;  %v1019_v12 = vadd.f32 %v1859_v55, %v983_v7 }
  0xe0   : > { %v849_v5 = vpop.f32.mrf.mxu3 }
  0xe1   : > { %v1576_v6 = vpack.c.bf16 %v1066_v3, %v1065_v2  ;;  %v722_v8 = vpop.f32.mrf.mxu0  ;;  %v850_v10 = vadd.f32 %v849_v5, %v760_v4  ;;  %v1051_v18 = vmax.f32 %v1019_v12, 0.0 }
  0xe2   : > { %v811_v9 = vpop.f32.mrf.mxu1 }
  0xe3   : > { %1612 = vst [vmem:[%s1869_s15 + $0x50] sm:$0xff] %v1576_v6   ;;  %v812_v11 = vadd.f32 %v811_v9, %v722_v8  ;;  %v999_v14 = vmul.f32 %v1853_v51, %v850_v10 }
  0xe5   : > { %v984_v13 = vmul.f32 %v1853_v51, %v812_v11  ;;  %v1035_v23 = vadd.f32 %v1859_v55, %v999_v14 }
  0xe7   : > { %v1020_v15 = vadd.f32 %v1859_v55, %v984_v13  ;;  %v762_v16 = vpop.f32.mrf.mxu2  ;;  %v1067_v28 = vmax.f32 %v1035_v23, 0.0 }
  0xe8   : > { %v851_v17 = vpop.f32.mrf.mxu3 }
  0xe9   : > { %v1052_v19 = vmax.f32 %v1020_v15, 0.0  ;;  %v852_v20 = vadd.f32 %v851_v17, %v762_v16  ;;  %v725_v21 = vpop.f32.mrf.mxu0 }
  0xea   : > { %v814_v22 = vpop.f32.mrf.mxu1 }
  0xeb   : > { %v1541_v24 = vpack.c.bf16 %v1052_v19, %v1051_v18  ;;  %v1000_v25 = vmul.f32 %v1853_v51, %v852_v20  ;;  %v815_v27 = vadd.f32 %v814_v22, %v725_v21 }
  0xed   : > { %1605 = vst [vmem:[%s1869_s15 + $0x18] sm:$0xff] %v1541_v24   ;;  %v1036_v26 = vadd.f32 %v1859_v55, %v1000_v25  ;;  %v985_v33 = vmul.f32 %v1853_v51, %v815_v27 }
  0xef   : > { %v1068_v29 = vmax.f32 %v1036_v26, 0.0  ;;  %v765_v30 = vpop.f32.mrf.mxu2  ;;  %v1021_v38 = vadd.f32 %v1859_v55, %v985_v33 }
  0xf0   : > { %v854_v31 = vpop.f32.mrf.mxu3 }
  0xf1   : > { %v1581_v32 = vpack.c.bf16 %v1068_v29, %v1067_v28  ;;  %v727_v34 = vpop.f32.mrf.mxu0  ;;  %v855_v36 = vadd.f32 %v854_v31, %v765_v30  ;;  %v1053_v44 = vmax.f32 %v1021_v38, 0.0 }
  0xf2   : > { %v816_v35 = vpop.f32.mrf.mxu1 }
  0xf3   : > { %1613 = vst [vmem:[%s1869_s15 + $0x58] sm:$0xff] %v1581_v32   ;;  %v817_v37 = vadd.f32 %v816_v35, %v727_v34  ;;  %v1001_v40 = vmul.f32 %v1853_v51, %v855_v36 }
  0xf5   : > { %v986_v39 = vmul.f32 %v1853_v51, %v817_v37  ;;  %v1037_v49 = vadd.f32 %v1859_v55, %v1001_v40 }
  0xf7   : > { %v1022_v41 = vadd.f32 %v1859_v55, %v986_v39  ;;  %v767_v42 = vpop.f32.mrf.mxu2  ;;  %v1069_v56 = vmax.f32 %v1037_v49, 0.0 }
  0xf8   : > { %v856_v43 = vpop.f32.mrf.mxu3 }
  0xf9   : > { %v1054_v45 = vmax.f32 %v1022_v41, 0.0  ;;  %v857_v46 = vadd.f32 %v856_v43, %v767_v42  ;;  %v730_v47 = vpop.f32.mrf.mxu0 }
  0xfa   : > { %v819_v48 = vpop.f32.mrf.mxu1 }
  0xfb   : > { %v1546_v50 = vpack.c.bf16 %v1054_v45, %v1053_v44  ;;  %v1002_v52 = vmul.f32 %v1853_v51, %v857_v46  ;;  %v820_v54 = vadd.f32 %v819_v48, %v730_v47 }
  0xfd   : > { %1606 = vst [vmem:[%s1869_s15 + $0x20] sm:$0xff] %v1546_v50   ;;  %v1038_v53 = vadd.f32 %v1859_v55, %v1002_v52  ;;  %v987_v61 = vmul.f32 %v1853_v51, %v820_v54 }
  0xff   : > { %v1070_v57 = vmax.f32 %v1038_v53, 0.0  ;;  %v770_v58 = vpop.f32.mrf.mxu2  ;;  %v1023_v2 = vadd.f32 %v1859_v55, %v987_v61 }
 0x100   : > { %v859_v59 = vpop.f32.mrf.mxu3 }
 0x101   : > { %v1586_v60 = vpack.c.bf16 %v1070_v57, %v1069_v56  ;;  %v732_v62 = vpop.f32.mrf.mxu0  ;;  %v860_v0 = vadd.f32 %v859_v59, %v770_v58  ;;  %v1055_v8 = vmax.f32 %v1023_v2, 0.0 }
 0x102   : > { %v821_v63 = vpop.f32.mrf.mxu1 }
 0x103   : > { %1614 = vst [vmem:[%s1869_s15 + $0x60] sm:$0xff] %v1586_v60   ;;  %v822_v1 = vadd.f32 %v821_v63, %v732_v62  ;;  %v1003_v4 = vmul.f32 %v1853_v51, %v860_v0 }
 0x105   : > { %v988_v3 = vmul.f32 %v1853_v51, %v822_v1  ;;  %v1039_v13 = vadd.f32 %v1859_v55, %v1003_v4 }
 0x107   : > { %v1024_v5 = vadd.f32 %v1859_v55, %v988_v3  ;;  %v772_v6 = vpop.f32.mrf.mxu2  ;;  %v1071_v18 = vmax.f32 %v1039_v13, 0.0 }
 0x108   : > { %v861_v7 = vpop.f32.mrf.mxu3 }
 0x109   : > { %v1056_v9 = vmax.f32 %v1024_v5, 0.0  ;;  %v862_v10 = vadd.f32 %v861_v7, %v772_v6  ;;  %v735_v11 = vpop.f32.mrf.mxu0 }
 0x10a   : > { %v824_v12 = vpop.f32.mrf.mxu1 }
 0x10b   : > { %v1551_v14 = vpack.c.bf16 %v1056_v9, %v1055_v8  ;;  %v1004_v15 = vmul.f32 %v1853_v51, %v862_v10  ;;  %v825_v17 = vadd.f32 %v824_v12, %v735_v11 }
 0x10d   : > { %1607 = vst [vmem:[%s1869_s15 + $0x28] sm:$0xff] %v1551_v14   ;;  %v1040_v16 = vadd.f32 %v1859_v55, %v1004_v15  ;;  %v989_v23 = vmul.f32 %v1853_v51, %v825_v17 }
 0x10f   : > { %v1072_v19 = vmax.f32 %v1040_v16, 0.0  ;;  %v775_v20 = vpop.f32.mrf.mxu2  ;;  %v1025_v28 = vadd.f32 %v1859_v55, %v989_v23 }
 0x110   : > { %v864_v21 = vpop.f32.mrf.mxu3 }
 0x111   : > { %v1591_v22 = vpack.c.bf16 %v1072_v19, %v1071_v18  ;;  %v737_v24 = vpop.f32.mrf.mxu0  ;;  %v865_v26 = vadd.f32 %v864_v21, %v775_v20  ;;  %v1057_v34 = vmax.f32 %v1025_v28, 0.0 }
 0x112   : > { %v826_v25 = vpop.f32.mrf.mxu1 }
 0x113   : > { %1615 = vst [vmem:[%s1869_s15 + $0x68] sm:$0xff] %v1591_v22   ;;  %v827_v27 = vadd.f32 %v826_v25, %v737_v24  ;;  %v1005_v30 = vmul.f32 %v1853_v51, %v865_v26 }
 0x115   : > { %v990_v29 = vmul.f32 %v1853_v51, %v827_v27  ;;  %v1041_v39 = vadd.f32 %v1859_v55, %v1005_v30 }
 0x117   : > { %v1026_v31 = vadd.f32 %v1859_v55, %v990_v29  ;;  %v777_v32 = vpop.f32.mrf.mxu2  ;;  %v1073_v44 = vmax.f32 %v1041_v39, 0.0 }
 0x118   : > { %v866_v33 = vpop.f32.mrf.mxu3 }
 0x119   : > { %v1058_v35 = vmax.f32 %v1026_v31, 0.0  ;;  %v867_v36 = vadd.f32 %v866_v33, %v777_v32  ;;  %v740_v37 = vpop.f32.mrf.mxu0 }
 0x11a   : > { %v829_v38 = vpop.f32.mrf.mxu1 }
 0x11b   : > { %v1556_v40 = vpack.c.bf16 %v1058_v35, %v1057_v34  ;;  %v1006_v41 = vmul.f32 %v1853_v51, %v867_v36  ;;  %v830_v43 = vadd.f32 %v829_v38, %v740_v37 }
 0x11d   : > { %1608 = vst [vmem:[%s1869_s15 + $0x30] sm:$0xff] %v1556_v40   ;;  %v1042_v42 = vadd.f32 %v1859_v55, %v1006_v41  ;;  %v991_v49 = vmul.f32 %v1853_v51, %v830_v43 }
 0x11f   : > { %v1074_v45 = vmax.f32 %v1042_v42, 0.0  ;;  %v780_v46 = vpop.f32.mrf.mxu2  ;;  %v1027_v56 = vadd.f32 %v1859_v55, %v991_v49 }
 0x120   : > { %v869_v47 = vpop.f32.mrf.mxu3 }
 0x121   : > { %v1596_v48 = vpack.c.bf16 %v1074_v45, %v1073_v44  ;;  %v742_v50 = vpop.f32.mrf.mxu0  ;;  %v870_v53 = vadd.f32 %v869_v47, %v780_v46  ;;  %v1059_v62 = vmax.f32 %v1027_v56, 0.0 }
 0x122   : > { %v831_v52 = vpop.f32.mrf.mxu1 }
 0x123   : > { %1616 = vst [vmem:[%s1869_s15 + $0x70] sm:$0xff] %v1596_v48   ;;  %v832_v54 = vadd.f32 %v831_v52, %v742_v50  ;;  %v1007_v58 = vmul.f32 %v1853_v51, %v870_v53 }
 0x125   : > { %v992_v57 = vmul.f32 %v1853_v51, %v832_v54  ;;  %v1043_v1 = vadd.f32 %v1859_v55, %v1007_v58 }
 0x127   : > { %v1028_v59 = vadd.f32 %v1859_v55, %v992_v57  ;;  %v782_v60 = vpop.f32.mrf.mxu2  ;;  %v1075_v5 = vmax.f32 %v1043_v1, 0.0 }
 0x128   : > { %v871_v61 = vpop.f32.mrf.mxu3 }
 0x129   : > { %v1060_v63 = vmax.f32 %v1028_v59, 0.0  ;;  %v872_v0 = vadd.f32 %v871_v61, %v782_v60 }
 0x12b   : > { %v1561_v2 = vpack.c.bf16 %v1060_v63, %v1059_v62  ;;  %v1008_v3 = vmul.f32 %v1853_v51, %v872_v0 }
 0x12d   : > { %1609 = vst [vmem:[%s1869_s15 + $0x38] sm:$0xff] %v1561_v2   ;;  %v1044_v4 = vadd.f32 %v1859_v55, %v1008_v3 }
 0x12f   : > { %v1076_v6 = vmax.f32 %v1044_v4, 0.0 }
 0x131   : > { %v1601_v7 = vpack.c.bf16 %v1076_v6, %v1075_v5 }
 0x133   : > { %1617 = vst [vmem:[%s1869_s15 + $0x78] sm:$0xff] %v1601_v7  }
 0x134 PF: > { %s14_s17 = sadd.s32 1, %s1682_s17   ;;  %s1960_s15 = smov %s1678_s16 }
 0x135   : > { %p11_p5 = scmp.ge.s32.totalorder %s14_s17, 4   ;;  %s1961_s16 = smov %s1963_s18 }
 0x137   :  { %13 = sbr.rel (!%p11_p5) target bundleno = 2 (0x2), region = 83 }

</bundles_post_ra>
